<compile_context>
chip_gen: v7x
topology: tpu7x:2x2x1
jax: 0.10.0
libtpu: 0.0.40
codegen_flags: <defaults>
</compile_context>

<pallas_src>
import functools

import jax
import jax.numpy as jnp
from jax.experimental import pallas as pl
from jax.experimental.pallas import tpu as pltpu


def _triplet_tile_kernel(a_ref, p_ref, n_ref, o_ref, *,
                         margin, eps, batch, tile_b, accumulate):
    """One (tile_b, D) tile: per-row L2 distances -> relu(dp - dn + margin) -> sum."""
    a = a_ref[...].astype(jnp.float32)
    p = p_ref[...].astype(jnp.float32)
    n = n_ref[...].astype(jnp.float32)

    dp = jnp.sqrt(jnp.sum((a - p + eps) ** 2, axis=1, keepdims=True))  # (tile_b, 1)
    dn = jnp.sqrt(jnp.sum((a - n + eps) ** 2, axis=1, keepdims=True))  # (tile_b, 1)
    losses = jnp.maximum(dp - dn + margin, 0.0)                        # (tile_b, 1)

    # Mask rows past the true batch (partial last tile / DMA padding). Keep the
    # where-select: padded garbage may be inf/NaN and must never reach the sum.
    row = jax.lax.broadcasted_iota(jnp.int32, losses.shape, 0) + pl.program_id(0) * tile_b
    losses = jnp.where(row < batch, losses, 0.0)

    tile_sum = jnp.sum(losses).reshape(1, 1, 1)

    if accumulate:
        # Single resident accumulator (single-TC chips, "arbitrary" grid axis).
        @pl.when(pl.program_id(0) == 0)
        def _init():
            o_ref[...] = jnp.zeros_like(o_ref)
        o_ref[...] += tile_sum
    else:
        # Per-tile partial sum (multi-TC chips, "parallel" grid axis).
        o_ref[...] = tile_sum


# Sublane alignment of the batch tile by element size (f32 / bf16 / int8).
_SUBLANE_ALIGN = {4: 8, 2: 16, 1: 32}


def _tensorcores_per_chip():
    """Best-effort detection: 2 TCs/chip on v7x, 1 on v5e/v6e (safe fallback 1)."""
    try:
        kind = jax.devices()[0].device_kind.lower()
    except Exception:
        return 1
    return 2 if ("v7" in kind or "7x" in kind) else 1


def triplet_loss(anchor, positive, negative, margin=1.0, eps=1e-6, max_tile_rows=None):
    assert anchor.shape == positive.shape == negative.shape
    assert anchor.ndim == 2
    B, D = anchor.shape
    itemsize = jnp.dtype(anchor.dtype).itemsize
    align = _SUBLANE_ALIGN.get(itemsize, 8)

    cores = _tensorcores_per_chip()
    # Per-input tile budget: ~6 MiB on 128-MiB-VMEM chips (v5e/v6e), ~4 MiB on v7x
    # (64 MiB per TC). 3 inputs x 2 pipeline buffers => ~36 MiB / ~24 MiB resident.
    tile_budget_bytes = (4 << 20) if cores >= 2 else (6 << 20)
    vmem_limit_bytes = (48 << 20) if cores >= 2 else (64 << 20)

    max_rows = max(tile_budget_bytes // max(D * itemsize, 1), 1)
    cap = max(align, (max_rows // align) * align)
    if max_tile_rows is not None:  # test / tuning override
        cap = min(cap, max(align, (int(max_tile_rows) // align) * align))
    tile_b = B if B <= cap else cap
    num_tiles = pl.cdiv(B, tile_b)

    # v7x: make sure the parallel axis has >= 2 grid steps so both TCs get work.
    if cores >= 2 and num_tiles == 1 and B > align:
        half = ((-(-B // 2) + align - 1) // align) * align
        if half < B:
            tile_b = half
            num_tiles = pl.cdiv(B, tile_b)

    accumulate = cores == 1
    kernel = functools.partial(
        _triplet_tile_kernel, margin=float(margin), eps=float(eps),
        batch=B, tile_b=tile_b, accumulate=accumulate)

    if accumulate:
        out_shape = jax.ShapeDtypeStruct((1, 1, 1), jnp.float32)
        out_specs = pl.BlockSpec((1, 1, 1), lambda i: (0, 0, 0))
        semantics = ("arbitrary",)
    else:
        out_shape = jax.ShapeDtypeStruct((num_tiles, 1, 1), jnp.float32)
        out_specs = pl.BlockSpec((1, 1, 1), lambda i: (i, 0, 0))
        semantics = ("parallel",)

    out = pl.pallas_call(
        kernel,
        out_shape=out_shape,
        grid=(num_tiles,),
        in_specs=[pl.BlockSpec((tile_b, D), lambda i: (i, 0))] * 3,
        out_specs=out_specs,
        compiler_params=pltpu.CompilerParams(
            dimension_semantics=semantics,
            vmem_limit_bytes=vmem_limit_bytes,
        ),
    )(anchor, positive, negative)

    # Exact f32 partial sums; the mean divides by the true batch size once.
    return jnp.sum(out) / B


def triplet_loss_ref(anchor, positive, negative, margin=1.0, eps=1e-6):
    a = anchor.astype(jnp.float32)
    p = positive.astype(jnp.float32)
    n = negative.astype(jnp.float32)
    dp = jnp.sqrt(jnp.sum((a - p + eps) ** 2, axis=-1))
    dn = jnp.sqrt(jnp.sum((a - n + eps) ** 2, axis=-1))
    return jnp.mean(jnp.maximum(dp - dn + margin, 0.0))


def _check(B, D, margin=1.0, dtype=jnp.float32, max_tile_rows=None):
    ka, kp, kn = jax.random.split(jax.random.PRNGKey(0), 3)
    anchor = jax.random.normal(ka, (B, D), dtype=jnp.float32).astype(dtype)
    positive = jax.random.normal(kp, (B, D), dtype=jnp.float32).astype(dtype)
    negative = jax.random.normal(kn, (B, D), dtype=jnp.float32).astype(dtype)

    out = triplet_loss(anchor, positive, negative, margin=margin,
                       max_tile_rows=max_tile_rows)
    out = jax.block_until_ready(out)
    ref = triplet_loss_ref(anchor, positive, negative, margin=margin)
    assert jnp.allclose(out, ref, rtol=1e-5, atol=1e-5), (B, D, dtype, out, ref)
    return out


if __name__ == "__main__":
    # Primary small test (embedding-style triplet-loss shapes).
    _check(B=8, D=32, margin=1.0)
    # Multi-tile small-D path with a masked partial last tile.
    _check(B=200, D=32, margin=1.0, max_tile_rows=128)
    # Multi-tile wide-D path with a masked partial last tile.
    _check(B=20, D=256, margin=1.0, max_tile_rows=8)
    # Native bf16 streaming (dtype-dependent sublane alignment), partial last tile.
    _check(B=40, D=32, margin=1.0, dtype=jnp.bfloat16, max_tile_rows=16)
    print("KERNEL_OK")
</pallas_src>

<mosaic_0001>
module attributes {stable_mosaic.version = 11 : i64} {
  func.func @_triplet_tile_kernel(%arg0: i32, %arg1: memref<8x32xf32, #tpu.memory_space<vmem>>, %arg2: memref<8x32xf32, #tpu.memory_space<vmem>>, %arg3: memref<8x32xf32, #tpu.memory_space<vmem>>, %arg4: memref<1x1x1xf32, #tpu.memory_space<vmem>>) attributes {dimension_semantics = [#tpu.dimension_semantics<arbitrary>], iteration_bounds = array<i64: 1>, scalar_prefetch = 0 : i64, scratch_operands = 0 : i64, tpu.core_type = #tpu.core_type<tc>, window_params = [{transform_indices = @transform_0, window_bounds = array<i64: 8, 32>}, {transform_indices = @transform_1, window_bounds = array<i64: 8, 32>}, {transform_indices = @transform_2, window_bounds = array<i64: 8, 32>}, {pipeline_mode = #tpu.pipeline_mode<synchronous>, transform_indices = @transform_3, window_bounds = array<i64: 1, 1, 1>}]} {
    %c0 = arith.constant 0 : index
    %c0_0 = arith.constant 0 : index
    %0 = vector.load %arg1[%c0, %c0_0] : memref<8x32xf32, #tpu.memory_space<vmem>>, vector<8x32xf32>
    %c0_1 = arith.constant 0 : index
    %c0_2 = arith.constant 0 : index
    %1 = vector.load %arg2[%c0_1, %c0_2] : memref<8x32xf32, #tpu.memory_space<vmem>>, vector<8x32xf32>
    %c0_3 = arith.constant 0 : index
    %c0_4 = arith.constant 0 : index
    %2 = vector.load %arg3[%c0_3, %c0_4] : memref<8x32xf32, #tpu.memory_space<vmem>>, vector<8x32xf32>
    %3 = arith.subf %0, %1 : vector<8x32xf32>
    %cst = arith.constant 9.99999997E-7 : f32
    %4 = vector.broadcast %cst : f32 to vector<8x32xf32>
    %5 = arith.addf %3, %4 : vector<8x32xf32>
    %6 = arith.mulf %5, %5 : vector<8x32xf32>
    %cst_5 = arith.constant dense<0.000000e+00> : vector<8xf32>
    %7 = vector.multi_reduction <add>, %6, %cst_5 [1] : vector<8x32xf32> to vector<8xf32>
    %8 = vector.shape_cast %7 : vector<8xf32> to vector<8x1xf32>
    %9 = math.sqrt %8 : vector<8x1xf32>
    %10 = arith.subf %0, %2 : vector<8x32xf32>
    %cst_6 = arith.constant 9.99999997E-7 : f32
    %11 = vector.broadcast %cst_6 : f32 to vector<8x32xf32>
    %12 = arith.addf %10, %11 : vector<8x32xf32>
    %13 = arith.mulf %12, %12 : vector<8x32xf32>
    %cst_7 = arith.constant dense<0.000000e+00> : vector<8xf32>
    %14 = vector.multi_reduction <add>, %13, %cst_7 [1] : vector<8x32xf32> to vector<8xf32>
    %15 = vector.shape_cast %14 : vector<8xf32> to vector<8x1xf32>
    %16 = math.sqrt %15 : vector<8x1xf32>
    %17 = arith.subf %9, %16 : vector<8x1xf32>
    %cst_8 = arith.constant 1.000000e+00 : f32
    %18 = vector.broadcast %cst_8 : f32 to vector<8x1xf32>
    %19 = arith.addf %17, %18 : vector<8x1xf32>
    %cst_9 = arith.constant 0.000000e+00 : f32
    %20 = vector.broadcast %cst_9 : f32 to vector<8x1xf32>
    %21 = arith.maximumf %19, %20 : vector<8x1xf32>
    %22 = tpu.iota {dimensions = array<i32: 0>} : vector<8x1xi32>
    %c8_i32 = arith.constant 8 : i32
    %23 = arith.muli %arg0, %c8_i32 : i32
    %24 = vector.broadcast %23 : i32 to vector<8x1xi32>
    %25 = arith.addi %22, %24 : vector<8x1xi32>
    %c8_i32_10 = arith.constant 8 : i32
    %26 = vector.broadcast %c8_i32_10 : i32 to vector<8x1xi32>
    %27 = arith.cmpi slt, %25, %26 : vector<8x1xi32>
    %cst_11 = arith.constant 0.000000e+00 : f32
    %28 = vector.broadcast %cst_11 : f32 to vector<8x1xf32>
    %29 = arith.select %27, %21, %28 : vector<8x1xi1>, vector<8x1xf32>
    %30 = vector.shape_cast %29 : vector<8x1xf32> to vector<1x8x1xf32>
    %cst_12 = arith.constant dense<0.000000e+00> : vector<1xf32>
    %31 = vector.multi_reduction <add>, %30, %cst_12 [1, 2] : vector<1x8x1xf32> to vector<1xf32>
    %32 = vector.shape_cast %31 : vector<1xf32> to vector<1x1x1xf32>
    %33 = vector.extract %32[0, 0, 0] : f32 from vector<1x1x1xf32>
    %34 = vector.broadcast %33 : f32 to vector<1x1x1xf32>
    %c0_i32 = arith.constant 0 : i32
    %35 = arith.cmpi eq, %arg0, %c0_i32 : i32
    %36 = arith.extui %35 : i1 to i32
    %c0_i32_13 = arith.constant 0 : i32
    %37 = arith.cmpi ne, %36, %c0_i32_13 : i32
    scf.if %37 {
      %cst_20 = arith.constant 0.000000e+00 : f32
      %41 = vector.broadcast %cst_20 : f32 to vector<1x1x1xf32>
      %c0_21 = arith.constant 0 : index
      %c0_22 = arith.constant 0 : index
      %c0_23 = arith.constant 0 : index
      %42 = vector.load %arg4[%c0_21, %c0_22, %c0_23] : memref<1x1x1xf32, #tpu.memory_space<vmem>>, vector<1x1x1xf32>
      tpu.vector_store %arg4[%c0_21, %c0_22, %c0_23], %41 {strides = array<i32>} : memref<1x1x1xf32, #tpu.memory_space<vmem>>, vector<1x1x1xf32>,
    } else {
    }
    %c0_14 = arith.constant 0 : index
    %c0_15 = arith.constant 0 : index
    %c0_16 = arith.constant 0 : index
    %38 = vector.load %arg4[%c0_14, %c0_15, %c0_16] : memref<1x1x1xf32, #tpu.memory_space<vmem>>, vector<1x1x1xf32>
    %39 = arith.addf %38, %34 : vector<1x1x1xf32>
    %c0_17 = arith.constant 0 : index
    %c0_18 = arith.constant 0 : index
    %c0_19 = arith.constant 0 : index
    %40 = vector.load %arg4[%c0_17, %c0_18, %c0_19] : memref<1x1x1xf32, #tpu.memory_space<vmem>>, vector<1x1x1xf32>
    tpu.vector_store %arg4[%c0_17, %c0_18, %c0_19], %39 {strides = array<i32>} : memref<1x1x1xf32, #tpu.memory_space<vmem>>, vector<1x1x1xf32>,
    return
  }
  func.func @transform_0(%arg0: i32) -> (i32, i32) {
    %c0_i32 = arith.constant 0 : i32
    %c0_i32_0 = arith.constant 0 : i32
    return %arg0, %c0_i32 : i32, i32
  }
  func.func @transform_1(%arg0: i32) -> (i32, i32) {
    %c0_i32 = arith.constant 0 : i32
    %c0_i32_0 = arith.constant 0 : i32
    return %arg0, %c0_i32 : i32, i32
  }
  func.func @transform_2(%arg0: i32) -> (i32, i32) {
    %c0_i32 = arith.constant 0 : i32
    %c0_i32_0 = arith.constant 0 : i32
    return %arg0, %c0_i32 : i32, i32
  }
  func.func @transform_3(%arg0: i32) -> (i32, i32, i32) {
    %c0_i32 = arith.constant 0 : i32
    %c0_i32_0 = arith.constant 0 : i32
    %c0_i32_1 = arith.constant 0 : i32
    %c0_i32_2 = arith.constant 0 : i32
    return %c0_i32, %c0_i32_0, %c0_i32_1 : i32, i32, i32
  }
}

</mosaic_0001>

<bundles_post_ra>
// kernel: tpu_custom_call.1
= control target key start
LH: loop header
LB: loop body
LE: loop exit
PB: predicated region body
PF: predicated region fallthrough
CT: control target
= control target key end

     0   :  { %8 = vsyncpa [#allocation3], 0  ;;  %s308_s0 = inlined_call_operand.hbm [shape: f32[8,32], index: 0, kind: input, shape index: {}]   ;;  %s309_s1 = inlined_call_operand.hbm [shape: f32[8,32], index: 1, kind: input, shape index: {}]   ;;  %s310_s2 = inlined_call_operand.hbm [shape: f32[8,32], index: 2, kind: input, shape index: {}]   ;;  %s311_s3 = inlined_call_operand.hbm [shape: f32[1,1,1], index: 3, kind: output, shape index: {}]  }
   0x1   :  { %9 = vsyncpa [#allocation6], 0 }
   0x2   :  { %10 = vsyncpa [#allocation4], 0  ;;  %s233_s12 = smov [#allocation5]   ;;  %s234_s14 = smov [#allocation2]  }
   0x3   :  { %s27_s13 = sshll.u32 %s233_s12, 4  ;;  %s17_s15 = sshll.u32 %s234_s14, 4  ;;  %s28_s13 = int_to_ptr.vmem [resolvable:$true] %s27_s13  ;;  %s18_s15 = int_to_ptr.vmem [resolvable:$true] %s17_s15 }
   0x4   :  { %s139_s18 = scalar_lea.hbm %s309_s1, 128 }
   0x5   :  { %p140_p0 = scmp.ne.s32.totalorder %s309_s1, %s139_s18  ;;  %p143_p1 = scmp.lt.u32.totalorder %s139_s18, %s309_s1 }
   0x7   :  { %p145_p2 = pnand %p143_p1, %p140_p0 }
   0x9   :  { %148 = shalt.err (!%p145_p2)
}
   0xa   :  { %s149_s23 = scalar_lea.vmem %s28_s13, 128  ;;  %p154_p4 = scmp.lt.s32.totalorder %s28_s13, %s28_s13 }
   0xb   :  { %p150_p3 = scmp.ne.s32.totalorder %s28_s13, %s149_s23  ;;  %p155_p5 = scmp.lt.s32.totalorder %s149_s23, %s149_s23 }
   0xd   :  { %p156_p6 = por %p155_p5, %p154_p4 }
   0xf   :  { %p157_p7 = pnand %p156_p6, %p150_p3 }
  0x11   :  { %160 = shalt.err (!%p157_p7)
}
  0x12   :  { %30 = dma.hbm_to_vmem [thread:$0]  %s309_s1, 128, %s28_s13, [#allocation6]  }
  0x13   :  { %s161_s28 = scalar_lea.hbm %s308_s0, 128 }
  0x14   :  { %p162_p8 = scmp.ne.s32.totalorder %s308_s0, %s161_s28  ;;  %p165_p9 = scmp.lt.u32.totalorder %s161_s28, %s308_s0 }
  0x16   :  { %p167_p10 = pnand %p165_p9, %p162_p8 }
  0x18   :  { %170 = shalt.err (!%p167_p10)
}
  0x19   :  { %s171_s6 = scalar_lea.vmem %s18_s15, 128  ;;  %p176_p12 = scmp.lt.s32.totalorder %s18_s15, %s18_s15 }
  0x1a   :  { %p172_p11 = scmp.ne.s32.totalorder %s18_s15, %s171_s6  ;;  %p177_p13 = scmp.lt.s32.totalorder %s171_s6, %s171_s6 }
  0x1c   :  { %p178_p0 = por %p177_p13, %p176_p12 }
  0x1e   :  { %p179_p1 = pnand %p178_p0, %p172_p11 }
  0x20   :  { %182 = shalt.err (!%p179_p1)
}
  0x21   :  { %20 = dma.hbm_to_vmem [thread:$0]  %s308_s0, 128, %s18_s15, [#allocation3]  }
  0x22   :  { %s235_s8 = smov [#allocation7]   ;;  %s183_s12 = scalar_lea.hbm %s310_s2, 128 }
  0x23   :  { %s37_s9 = sshll.u32 %s235_s8, 4  ;;  %p184_p2 = scmp.ne.s32.totalorder %s310_s2, %s183_s12  ;;  %s38_s9 = int_to_ptr.vmem [resolvable:$true] %s37_s9 }
  0x24   :  { %p187_p3 = scmp.lt.u32.totalorder %s183_s12, %s310_s2 }
  0x26   :  { %p189_p4 = pnand %p187_p3, %p184_p2 }
  0x28   :  { %192 = shalt.err (!%p189_p4)
}
  0x29   :  { %s193_s18 = scalar_lea.vmem %s38_s9, 128  ;;  %p198_p6 = scmp.lt.s32.totalorder %s38_s9, %s38_s9 }
  0x2a   :  { %p194_p5 = scmp.ne.s32.totalorder %s38_s9, %s193_s18  ;;  %p199_p7 = scmp.lt.s32.totalorder %s193_s18, %s193_s18 }
  0x2c   :  { %p200_p8 = por %p199_p7, %p198_p6 }
  0x2e   :  { %p201_p9 = pnand %p200_p8, %p194_p5 }
  0x30   :  { %204 = shalt.err (!%p201_p9)
}
  0x31   :  { %40 = dma.hbm_to_vmem [thread:$0]  %s310_s2, 128, %s38_s9, [#allocation6]  }
  0x32   :  { %227 = dma.done.wait [#allocation3], 128  }
  0x33   :  { %228 = vsyncadd [#allocation3], 4294967168 }
  0x34   :  { %229 = dma.done.wait [#allocation6], 256  }
  0x35   :  { %230 = vsyncadd [#allocation6], 4294967040  ;;  %vm106_vm0 = vcmask 0   ;;  %v236_v0 = vmov 0.0   ;;  %v50_v1 = vld [vmem:[#allocation2] sm:$0xff]  ;;  %v51_v2 = vld [vmem:[#allocation5] sm:$0xff] }
  0x36   :  { %107 = vst.msk [vmem:[#allocation8] sm:$0x1] %vm106_vm0, %v236_v0  ;;  %v52_v3 = vld [vmem:[#allocation7] sm:$0xff]  ;;  %v53_v4 = vsub.f32 %v50_v1, %v51_v2  ;;  %vm56_vm1 = vcmask 261120   ;;  %vm90_vm6 = vcmask 7168   ;;  %s237_s2 = smov [#allocation8]  }
  0x37   :  { %v67_v5 = vsub.f32 %v50_v1, %v52_v3  ;;  %s118_s19 = sshll.u32 %s237_s2, 4  ;;  %s119_s19 = int_to_ptr.vmem [resolvable:$true] %s118_s19 }
  0x38   :  { %v54_v6 = vadd.f32 1e-06, %v53_v4  ;;  %s205_s21 = scalar_lea.vmem %s119_s19, 16  ;;  %s209_s22 = scalar_lea.vmem %s119_s19, 32 }
  0x39   :  { %v68_v7 = vadd.f32 1e-06, %v67_v5  ;;  %p206_p10 = scmp.ne.s32.totalorder %s119_s19, %s205_s21  ;;  %p210_p11 = scmp.lt.s32.totalorder %s119_s19, %s119_s19 }
  0x3a   :  { %v55_v8 = vmul.f32 %v54_v6, %v54_v6  ;;  %p211_p12 = scmp.lt.s32.totalorder %s209_s22, %s205_s21 }
  0x3b   :  { %v69_v9 = vmul.f32 %v68_v7, %v68_v7 }
  0x3c   :  { %v57_v10 = vsel %vm56_vm1, %v55_v8, 0.0  ;;  %p212_p13 = por %p211_p12, %p210_p11 }
  0x3d   :  { %58 = vadd.xlane.f32.xlu0 %v57_v10  ;;  %v70_v11 = vsel %vm56_vm1, %v69_v9, 0.0  ;;  %v108_v35 = vld [vmem:[#allocation8] sm:$0x1] }
  0x3e   :  { %p213_p0 = pnand %p212_p13, %p206_p10 }
  0x41   :  { %71 = vadd.xlane.f32.xlu0 %v70_v11 }
  0xca   :  { %v59_v12 = vpop.xlane.xlu0 %58 }
  0xcb   :  { %135 = vrsqrt.f32 %v59_v12  ;;  %vm62_vm2 = vcmp.eq.f32.partialorder %v59_v12, inf  ;;  %v65_v19 = vand.u32 2147483648, %v59_v12  ;;  %vm64_vm4 = vcmp.eq.f32.partialorder %v59_v12, 0.0 }
  0xce   :  { %v72_v13 = vpop.xlane.xlu0 %71 }
  0xcf   :  { %137 = vrsqrt.f32 %v72_v13  ;;  %vm75_vm3 = vcmp.eq.f32.partialorder %v72_v13, inf  ;;  %v78_v20 = vand.u32 2147483648, %v72_v13  ;;  %vm77_vm5 = vcmp.eq.f32.partialorder %v72_v13, 0.0 }
  0xd5   :  { %v136_v14 = vpop.eup %135 }
  0xd6   :  { %v61_v15 = vmul.f32 %v136_v14, %v59_v12 }
  0xd8   :  { %v63_v18 = vsel %vm62_vm2, %v59_v12, %v61_v15 }
  0xd9   :  { %v138_v16 = vpop.eup %137  ;;  %v66_v22 = vsel %vm64_vm4, %v65_v19, %v63_v18 }
  0xda   :  { %v74_v17 = vmul.f32 %v138_v16, %v72_v13 }
  0xdc   :  { %v76_v21 = vsel %vm75_vm3, %v72_v13, %v74_v17 }
  0xdd   :  { %v79_v23 = vsel %vm77_vm5, %v78_v20, %v76_v21 }
  0xde   :  { %v80_v24 = vsub.f32 %v66_v22, %v79_v23 }
  0xe0   :  { %v81_v25 = vadd.f32 1.0, %v80_v24 }
  0xe2   :  { %v82_v26 = vmax.f32 %v81_v25, 0.0 }
  0xe4   :  { %v91_v27 = vsel %vm90_vm6, %v82_v26, 0.0 }
  0xe5   :  { %92 = vadd.xlane.f32.xlu1 %v91_v27 }
 0x172   :  { %v93_v28 = vpop.xlane.xlu1 %92 }
 0x173   :  { %v94_v29 = vrot.slane %v93_v28, 4 }
 0x175   :  { %v95_v30 = vadd.f32 %v94_v29, %v93_v28 }
 0x177   :  { %v96_v31 = vrot.slane %v95_v30, 2 }
 0x179   :  { %v97_v32 = vadd.f32 %v96_v31, %v95_v30 }
 0x17b   :  { %v98_v33 = vrot.slane %v97_v32, 1 }
 0x17d   :  { %v99_v34 = vadd.f32 %v98_v33, %v97_v32 }
 0x17f   :  { %128 = vpush %v99_v34 }
 0x1b0   :  { %s129_s20 = spop %128 }
 0x1b1   :  { %v101_v36 = vstv %s129_s20 }
 0x1b2   :  { %v109_v37 = vadd.f32 %v108_v35, %v101_v36 }
 0x1b4   :  { %111 = vst.msk [vmem:[#allocation8] sm:$0x1] %vm106_vm0, %v109_v37 }
 0x1b5   :  { %216 = shalt.err (!%p213_p0)
}
 0x1b6   :  { %s217_s25 = scalar_lea.hbm %s311_s3, 16 }
 0x1b7   :  { %p218_p1 = scmp.ne.s32.totalorder %s311_s3, %s217_s25  ;;  %p221_p2 = scmp.lt.u32.totalorder %s217_s25, %s311_s3 }
 0x1b9   :  { %p223_p3 = pnand %p221_p2, %p218_p1 }
 0x1bb   :  { %226 = shalt.err (!%p223_p3)
}
 0x1bc   :  { %121 = dma.vmem_to_hbm [thread:$0]  %s119_s19, 16, %s311_s3, [#allocation4]  }
 0x1bd   :  { %231 = dma.done.wait [#allocation4], 16  }
 0x1be   :  { %232 = vsyncadd [#allocation4], 4294967280 }
 0x1bf   :  { %125 = vsyncpa [#allocation3], 1 }
 0x1c0   :  { %126 = vsyncpa [#allocation6], 1 }
 0x1c1   :  { %127 = vsyncpa [#allocation4], 1 }

</bundles_post_ra>
